<compile_context>
chip_gen: v5e
topology: v5e:2x2
jax: 0.10.0
libtpu: 0.0.40
codegen_flags: <defaults>
</compile_context>

<pallas_src>
import functools

import jax
import jax.numpy as jnp
from jax.experimental import pallas as pl
from jax.experimental.pallas import tpu as pltpu

_LANE = 128
_NEG_BIG = -1e30  # finite "minus infinity" for padded logit columns


def actor_kernel(x_ref, w1_ref, b1_ref, w2_ref, b2_ref, w3_ref, b3_ref, out_ref):
    # bf16 operands for the MXU, f32 accumulation everywhere.
    x = x_ref[...].astype(jnp.bfloat16)                                   # [TB, S]

    # Layer 1: Linear + ReLU
    h1 = jnp.dot(x, w1_ref[...], preferred_element_type=jnp.float32) + b1_ref[...]
    h1 = jnp.maximum(h1, 0.0)                                             # [TB, Hp] f32

    # Layer 2: Linear + ReLU
    h2 = jnp.dot(h1.astype(jnp.bfloat16), w2_ref[...],
                 preferred_element_type=jnp.float32) + b2_ref[...]
    h2 = jnp.maximum(h2, 0.0)                                             # [TB, Hp] f32

    # Layer 3: Linear (padded action columns carry a -1e30 bias)
    logits = jnp.dot(h2.astype(jnp.bfloat16), w3_ref[...],
                     preferred_element_type=jnp.float32) + b3_ref[...]    # [TB, Ap] f32

    # Numerically stable softmax over the (lane-dense, padded) last dim.
    m = jnp.max(logits, axis=-1, keepdims=True)
    e = jnp.exp(logits - m)                         # padded cols underflow to exactly 0
    probs = e / jnp.sum(e, axis=-1, keepdims=True)  # exact divide (PPO log-prob safety)

    # Store only the real action columns (narrow masked store beats the padded
    # f32 slab writeback by ~64x in HBM traffic).
    out_ref[...] = probs[:, : out_ref.shape[-1]].astype(out_ref.dtype)


def _round_up(v, m):
    return ((v + m - 1) // m) * m


def prepare_params(params):
    """Pad hidden/action dims to 128 lanes and cast weights to bf16.

    Call once at init (and after every parameter update), NOT per forward.
    Biases stay f32; padded action-bias columns are -1e30 so they vanish in
    the softmax.  Zero-padded weight columns/rows are semantics preserving.
    """
    w1, b1, w2, b2, w3, b3 = params
    H = w1.shape[1]
    A = w3.shape[1]
    Hp = max(_LANE, _round_up(H, _LANE))
    Ap = max(_LANE, _round_up(A, _LANE))
    w1p = jnp.pad(w1, ((0, 0), (0, Hp - H))).astype(jnp.bfloat16)
    b1p = jnp.pad(b1, ((0, 0), (0, Hp - H)))
    w2p = jnp.pad(w2, ((0, Hp - H), (0, Hp - H))).astype(jnp.bfloat16)
    b2p = jnp.pad(b2, ((0, 0), (0, Hp - H)))
    w3p = jnp.pad(w3, ((0, Hp - H), (0, Ap - A))).astype(jnp.bfloat16)
    b3p = jnp.pad(b3, ((0, 0), (0, Ap - A)), constant_values=_NEG_BIG)
    return (w1p, b1p, w2p, b2p, w3p, b3p)


@functools.partial(jax.jit, static_argnames=("action_dim", "block_b"))
def actor_forward(x, padded_params, action_dim, *, block_b=4096):
    """Batched actor forward.  x: [B, state_dim] -> probs [B, action_dim]."""
    w1p, b1p, w2p, b2p, w3p, b3p = padded_params
    B, S = x.shape
    Hp = w1p.shape[1]
    Ap = w3p.shape[1]
    A = action_dim

    # Batch tiling: tile (nearly) divides B to minimize dead rows; force >= 2
    # grid steps when B > 8 so both v7x TensorCores get work (no-op on v5e/v6e).
    n_steps = pl.cdiv(B, block_b)
    if B > 8:
        n_steps = max(n_steps, 2)
    TB = min(block_b, _round_up(pl.cdiv(B, n_steps), 8))
    Bp = _round_up(B, TB)
    xp = x if Bp == B else jnp.pad(x, ((0, Bp - B), (0, 0)))
    grid = (Bp // TB,)

    out = pl.pallas_call(
        actor_kernel,
        out_shape=jax.ShapeDtypeStruct((Bp, A), jnp.float32),
        grid=grid,
        in_specs=[
            pl.BlockSpec((TB, S), lambda i: (i, 0)),     # x: streamed per grid step
            pl.BlockSpec((S, Hp), lambda i: (0, 0)),     # weights/biases: VMEM-resident
            pl.BlockSpec((1, Hp), lambda i: (0, 0)),
            pl.BlockSpec((Hp, Hp), lambda i: (0, 0)),
            pl.BlockSpec((1, Hp), lambda i: (0, 0)),
            pl.BlockSpec((Hp, Ap), lambda i: (0, 0)),
            pl.BlockSpec((1, Ap), lambda i: (0, 0)),
        ],
        out_specs=pl.BlockSpec((TB, A), lambda i: (i, 0)),
        compiler_params=pltpu.CompilerParams(
            dimension_semantics=("parallel",),           # megacore: split batch grid
            vmem_limit_bytes=48 << 20,                   # explicit budget (v7x-safe)
        ),
    )(xp, w1p, b1p, w2p, b2p, w3p, b3p)

    return out if Bp == B else out[:B]


def init_params(key, state_dim, action_dim, hidden_dim=64):
    """Deterministic init mimicking PyTorch Linear default (uniform +/- 1/sqrt(fan_in))."""
    def linear(k, fan_in, fan_out):
        kw, kb = jax.random.split(k)
        bound = 1.0 / jnp.sqrt(fan_in)
        w = jax.random.uniform(kw, (fan_in, fan_out), jnp.float32, -bound, bound)
        b = jax.random.uniform(kb, (1, fan_out), jnp.float32, -bound, bound)
        return w, b

    k1, k2, k3 = jax.random.split(key, 3)
    w1, b1 = linear(k1, state_dim, hidden_dim)
    w2, b2 = linear(k2, hidden_dim, hidden_dim)
    w3, b3 = linear(k3, hidden_dim, action_dim)
    return (w1, b1, w2, b2, w3, b3)


def reference_forward(x, params):
    w1, b1, w2, b2, w3, b3 = params
    h1 = jnp.maximum(x @ w1 + b1, 0.0)
    h2 = jnp.maximum(h1 @ w2 + b2, 0.0)
    logits = h2 @ w3 + b3
    return jax.nn.softmax(logits, axis=-1)


if __name__ == "__main__":
    # CartPole-like dims: state_dim=4, action_dim=2, hidden_dim=64
    state_dim, action_dim, hidden_dim = 4, 2, 64

    key = jax.random.PRNGKey(0)
    kx, kx2, kx3, kp = jax.random.split(key, 4)
    params = init_params(kp, state_dim, action_dim, hidden_dim)
    padded_params = prepare_params(params)   # hoisted out of the hot path

    # bf16 matmul operands (f32 accumulation) -> relaxed probability tolerance.
    TOL = 2e-2

    # --- small-batch correctness (single grid step) ---
    x_small = jax.random.normal(kx, (8, state_dim), dtype=jnp.float32)
    out_small = jax.block_until_ready(actor_forward(x_small, padded_params, action_dim))
    ref_small = reference_forward(x_small, params)
    assert out_small.shape == (8, action_dim)
    assert jnp.allclose(out_small, ref_small, atol=TOL), "small-batch mismatch"
    assert jnp.allclose(jnp.sum(out_small, axis=-1), 1.0, atol=1e-3)

    # --- batched path exercising the grid (4 grid steps, weights VMEM-resident) ---
    x_big = jax.random.normal(kx2, (256, state_dim), dtype=jnp.float32)
    out_big = jax.block_until_ready(actor_forward(x_big, padded_params, action_dim, block_b=64))
    ref_big = reference_forward(x_big, params)
    assert out_big.shape == (256, action_dim)
    assert jnp.allclose(out_big, ref_big, atol=TOL), "batched mismatch"
    assert jnp.allclose(jnp.sum(out_big, axis=-1), 1.0, atol=1e-3)

    # --- ragged batch (padded rows trimmed only when present) ---
    x_rag = jax.random.normal(kx3, (100, state_dim), dtype=jnp.float32)
    out_rag = jax.block_until_ready(actor_forward(x_rag, padded_params, action_dim, block_b=64))
    ref_rag = reference_forward(x_rag, params)
    assert out_rag.shape == (100, action_dim)
    assert jnp.allclose(out_rag, ref_rag, atol=TOL), "ragged-batch mismatch"
    assert jnp.allclose(jnp.sum(out_rag, axis=-1), 1.0, atol=1e-3)

    print("KERNEL_OK")
</pallas_src>

<mosaic_0001>
module attributes {stable_mosaic.version = 11 : i64} {
  func.func @actor_kernel(%arg0: i32, %arg1: memref<8x4xf32, #tpu.memory_space<vmem>>, %arg2: memref<4x128xbf16, #tpu.memory_space<vmem>>, %arg3: memref<1x128xf32, #tpu.memory_space<vmem>>, %arg4: memref<128x128xbf16, #tpu.memory_space<vmem>>, %arg5: memref<1x128xf32, #tpu.memory_space<vmem>>, %arg6: memref<128x128xbf16, #tpu.memory_space<vmem>>, %arg7: memref<1x128xf32, #tpu.memory_space<vmem>>, %arg8: memref<8x2xf32, #tpu.memory_space<vmem>>) attributes {dimension_semantics = [#tpu.dimension_semantics<parallel>], iteration_bounds = array<i64: 1>, scalar_prefetch = 0 : i64, scratch_operands = 0 : i64, tpu.core_type = #tpu.core_type<tc>, window_params = [{transform_indices = @transform_0, window_bounds = array<i64: 8, 4>}, {pipeline_mode = #tpu.pipeline_mode<synchronous>, transform_indices = @transform_1, window_bounds = array<i64: 4, 128>}, {pipeline_mode = #tpu.pipeline_mode<synchronous>, transform_indices = @transform_2, window_bounds = array<i64: 1, 128>}, {pipeline_mode = #tpu.pipeline_mode<synchronous>, transform_indices = @transform_3, window_bounds = array<i64: 128, 128>}, {pipeline_mode = #tpu.pipeline_mode<synchronous>, transform_indices = @transform_4, window_bounds = array<i64: 1, 128>}, {pipeline_mode = #tpu.pipeline_mode<synchronous>, transform_indices = @transform_5, window_bounds = array<i64: 128, 128>}, {pipeline_mode = #tpu.pipeline_mode<synchronous>, transform_indices = @transform_6, window_bounds = array<i64: 1, 128>}, {transform_indices = @transform_7, window_bounds = array<i64: 8, 2>}]} {
    %c0 = arith.constant 0 : index
    %c0_0 = arith.constant 0 : index
    %0 = vector.load %arg1[%c0, %c0_0] : memref<8x4xf32, #tpu.memory_space<vmem>>, vector<8x4xf32>
    %1 = arith.truncf %0 : vector<8x4xf32> to vector<8x4xbf16>
    %c0_1 = arith.constant 0 : index
    %c0_2 = arith.constant 0 : index
    %2 = vector.load %arg2[%c0_1, %c0_2] : memref<4x128xbf16, #tpu.memory_space<vmem>>, vector<4x128xbf16>
    %cst = arith.constant dense<0.000000e+00> : vector<8x128xf32>
    %3 = tpu.matmul %1, %2, %cst {dimension_numbers = #tpu.dot_dimension_numbers<[1], [0], [0], [1], [0, 0, 1, 1], [], []>} : vector<8x4xbf16>, vector<4x128xbf16>, vector<8x128xf32> -> vector<8x128xf32>
    %c0_3 = arith.constant 0 : index
    %c0_4 = arith.constant 0 : index
    %4 = vector.load %arg3[%c0_3, %c0_4] : memref<1x128xf32, #tpu.memory_space<vmem>>, vector<1x128xf32>
    %5 = vector.broadcast %4 : vector<1x128xf32> to vector<8x128xf32>
    %6 = arith.addf %3, %5 : vector<8x128xf32>
    %cst_5 = arith.constant 0.000000e+00 : f32
    %7 = vector.broadcast %cst_5 : f32 to vector<8x128xf32>
    %8 = arith.maximumf %6, %7 : vector<8x128xf32>
    %9 = arith.truncf %8 : vector<8x128xf32> to vector<8x128xbf16>
    %c0_6 = arith.constant 0 : index
    %c0_7 = arith.constant 0 : index
    %10 = vector.load %arg4[%c0_6, %c0_7] : memref<128x128xbf16, #tpu.memory_space<vmem>>, vector<128x128xbf16>
    %cst_8 = arith.constant dense<0.000000e+00> : vector<8x128xf32>
    %11 = tpu.matmul %9, %10, %cst_8 {dimension_numbers = #tpu.dot_dimension_numbers<[1], [0], [0], [1], [0, 0, 1, 1], [], []>} : vector<8x128xbf16>, vector<128x128xbf16>, vector<8x128xf32> -> vector<8x128xf32>
    %c0_9 = arith.constant 0 : index
    %c0_10 = arith.constant 0 : index
    %12 = vector.load %arg5[%c0_9, %c0_10] : memref<1x128xf32, #tpu.memory_space<vmem>>, vector<1x128xf32>
    %13 = vector.broadcast %12 : vector<1x128xf32> to vector<8x128xf32>
    %14 = arith.addf %11, %13 : vector<8x128xf32>
    %cst_11 = arith.constant 0.000000e+00 : f32
    %15 = vector.broadcast %cst_11 : f32 to vector<8x128xf32>
    %16 = arith.maximumf %14, %15 : vector<8x128xf32>
    %17 = arith.truncf %16 : vector<8x128xf32> to vector<8x128xbf16>
    %c0_12 = arith.constant 0 : index
    %c0_13 = arith.constant 0 : index
    %18 = vector.load %arg6[%c0_12, %c0_13] : memref<128x128xbf16, #tpu.memory_space<vmem>>, vector<128x128xbf16>
    %cst_14 = arith.constant dense<0.000000e+00> : vector<8x128xf32>
    %19 = tpu.matmul %17, %18, %cst_14 {dimension_numbers = #tpu.dot_dimension_numbers<[1], [0], [0], [1], [0, 0, 1, 1], [], []>} : vector<8x128xbf16>, vector<128x128xbf16>, vector<8x128xf32> -> vector<8x128xf32>
    %c0_15 = arith.constant 0 : index
    %c0_16 = arith.constant 0 : index
    %20 = vector.load %arg7[%c0_15, %c0_16] : memref<1x128xf32, #tpu.memory_space<vmem>>, vector<1x128xf32>
    %21 = vector.broadcast %20 : vector<1x128xf32> to vector<8x128xf32>
    %22 = arith.addf %19, %21 : vector<8x128xf32>
    %cst_17 = arith.constant dense<0xFF800000> : vector<8xf32>
    %23 = vector.multi_reduction <maximumf>, %22, %cst_17 [1] : vector<8x128xf32> to vector<8xf32>
    %24 = vector.shape_cast %23 : vector<8xf32> to vector<8x1xf32>
    %25 = vector.broadcast %24 : vector<8x1xf32> to vector<8x128xf32>
    %26 = arith.subf %22, %25 : vector<8x128xf32>
    %27 = math.exp %26 : vector<8x128xf32>
    %cst_18 = arith.constant dense<0.000000e+00> : vector<8xf32>
    %28 = vector.multi_reduction <add>, %27, %cst_18 [1] : vector<8x128xf32> to vector<8xf32>
    %29 = vector.shape_cast %28 : vector<8xf32> to vector<8x1xf32>
    %30 = vector.broadcast %29 : vector<8x1xf32> to vector<8x128xf32>
    %31 = arith.divf %27, %30 : vector<8x128xf32>
    %32 = vector.extract_strided_slice %31 {offsets = [0, 0], sizes = [8, 2], strides = [1, 1]} : vector<8x128xf32> to vector<8x2xf32>
    %c0_19 = arith.constant 0 : index
    %c0_20 = arith.constant 0 : index
    %33 = vector.load %arg8[%c0_19, %c0_20] : memref<8x2xf32, #tpu.memory_space<vmem>>, vector<8x2xf32>
    tpu.vector_store %arg8[%c0_19, %c0_20], %32 {strides = array<i32>} : memref<8x2xf32, #tpu.memory_space<vmem>>, vector<8x2xf32>,
    return
  }
  func.func @transform_0(%arg0: i32) -> (i32, i32) {
    %c0_i32 = arith.constant 0 : i32
    %c0_i32_0 = arith.constant 0 : i32
    return %arg0, %c0_i32 : i32, i32
  }
  func.func @transform_1(%arg0: i32) -> (i32, i32) {
    %c0_i32 = arith.constant 0 : i32
    %c0_i32_0 = arith.constant 0 : i32
    %c0_i32_1 = arith.constant 0 : i32
    return %c0_i32, %c0_i32_0 : i32, i32
  }
  func.func @transform_2(%arg0: i32) -> (i32, i32) {
    %c0_i32 = arith.constant 0 : i32
    %c0_i32_0 = arith.constant 0 : i32
    %c0_i32_1 = arith.constant 0 : i32
    return %c0_i32, %c0_i32_0 : i32, i32
  }
  func.func @transform_3(%arg0: i32) -> (i32, i32) {
    %c0_i32 = arith.constant 0 : i32
    %c0_i32_0 = arith.constant 0 : i32
    %c0_i32_1 = arith.constant 0 : i32
    return %c0_i32, %c0_i32_0 : i32, i32
  }
  func.func @transform_4(%arg0: i32) -> (i32, i32) {
    %c0_i32 = arith.constant 0 : i32
    %c0_i32_0 = arith.constant 0 : i32
    %c0_i32_1 = arith.constant 0 : i32
    return %c0_i32, %c0_i32_0 : i32, i32
  }
  func.func @transform_5(%arg0: i32) -> (i32, i32) {
    %c0_i32 = arith.constant 0 : i32
    %c0_i32_0 = arith.constant 0 : i32
    %c0_i32_1 = arith.constant 0 : i32
    return %c0_i32, %c0_i32_0 : i32, i32
  }
  func.func @transform_6(%arg0: i32) -> (i32, i32) {
    %c0_i32 = arith.constant 0 : i32
    %c0_i32_0 = arith.constant 0 : i32
    %c0_i32_1 = arith.constant 0 : i32
    return %c0_i32, %c0_i32_0 : i32, i32
  }
  func.func @transform_7(%arg0: i32) -> (i32, i32) {
    %c0_i32 = arith.constant 0 : i32
    %c0_i32_0 = arith.constant 0 : i32
    return %arg0, %c0_i32 : i32, i32
  }
}

</mosaic_0001>

<bundles_post_ra>
// kernel: actor_forward.1
= control target key start
LH: loop header
LB: loop body
LE: loop exit
PB: predicated region body
PF: predicated region fallthrough
CT: control target
= control target key end

     0   :  { %12 = vsyncpa [#allocation3], 0  ;;  %s495_s0 = inlined_call_operand.vmem [shape: f32[8,4], index: 0, kind: input, shape index: {}]   ;;  %s496_s1 = inlined_call_operand.vmem [shape: bf16[4,128], index: 1, kind: input, shape index: {}]   ;;  %s497_s2 = inlined_call_operand.vmem [shape: f32[1,128], index: 2, kind: input, shape index: {}]   ;;  %s498_s3 = inlined_call_operand.hbm [shape: bf16[128,128], index: 3, kind: input, shape index: {}]   ;;  %s499_s4 = inlined_call_operand.vmem [shape: f32[1,128], index: 4, kind: input, shape index: {}]   ;;  %s500_s5 = inlined_call_operand.hbm [shape: bf16[128,128], index: 5, kind: input, shape index: {}]   ;;  %s501_s6 = inlined_call_operand.vmem [shape: f32[1,128], index: 6, kind: input, shape index: {}]   ;;  %s502_s7 = inlined_call_operand.vmem [shape: f32[8,2], index: 7, kind: output, shape index: {}]  }
   0x1   :  { %s24_s26 = sshll.u32 %s498_s3, 4  ;;  %s25_s26 = int_to_ptr.hbm [resolvable:$true] %s24_s26 }
   0x2   :  { %13 = vsyncpa [#allocation5], 0  ;;  %s427_s27 = smov [#allocation2]   ;;  %s39_s8 = sshll.u32 %s500_s5, 4  ;;  %s40_s8 = int_to_ptr.hbm [resolvable:$true] %s39_s8 }
   0x3   :  { %s26_s28 = sshll.u32 %s427_s27, 4  ;;  %s428_s9 = smov 64   ;;  %s27_s28 = int_to_ptr.vmem [resolvable:$true] %s26_s28 }
   0x4   :  { %s429_s10 = smov 4   ;;  %s430_s11 = smov [#allocation4]  }
   0x5   :  { %32 = dma.hbm_to_vmem [thread:$0]  %s25_s26, 1024, %s27_s28, [#allocation3], %s428_s9, %s428_s9, %s429_s10  }
   0x6   :  { %s41_s12 = sshll.u32 %s430_s11, 4  ;;  %s42_s12 = int_to_ptr.vmem [resolvable:$true] %s41_s12 }
   0x7   :  { %47 = dma.hbm_to_vmem [thread:$0]  %s40_s8, 1024, %s42_s12, [#allocation5], %s428_s9, %s428_s9, %s429_s10  }
   0x8   :  { %423 = dma.done.wait [#allocation3], 1024  }
   0x9   :  { %424 = vsyncadd [#allocation3], 4294966272 }
   0xa   :  { %425 = dma.done.wait [#allocation5], 1024  }
   0xb   :  { %426 = vsyncadd [#allocation5], 4294966272  ;;  %vm70_vm0 = vcmask 1041408   ;;  %v61_v0 = vld [vmem:[%s496_s1] sm:$0x3]  ;;  %v355_v2 = vld [vmem:[#allocation2 + $0x38] sm:$0xff] }
   0xc   :  { %v59_v1 = vld [vmem:[%s495_s0] sm:$0xff]  ;;  %v72_v3 = vsel %vm70_vm0, %v61_v0, 0  ;;  %vm66_vm1 = vcmask 31744   ;;  %157 = vmatpush.bf16.msra.mxu1 %v355_v2  ;;  %v354_v5 = vld [vmem:[#allocation2 + $0x30] sm:$0xff]  ;;  %v353_v6 = vld [vmem:[#allocation2 + $0x28] sm:$0xff]  ;;  %vm275_vm6 = vcmask 15360  }
   0xd   :  { %v60_v4 = vpack.c.bf16 %v59_v1, %v59_v1  ;;  %81 = vmatpush.bf16.msra.mxu0 %v72_v3  ;;  %v352_v7 = vld [vmem:[#allocation2 + $0x20] sm:$0xff]  ;;  %v351_v8 = vld [vmem:[#allocation2 + $0x18] sm:$0xff]  ;;  %v350_v9 = vld [vmem:[#allocation2 + $0x10] sm:$0xff] }
   0xe   :  { %v349_v10 = vld [vmem:[#allocation2 + $0x8] sm:$0xff]  ;;  %v348_v11 = vld [vmem:[#allocation2] sm:$0xff]  ;;  %v363_v12 = vld [vmem:[#allocation4 + $0x38] sm:$0xff] }
   0xf   :  { %240 = vmatpush.bf16.msra.mxu2 %v363_v12  ;;  %v362_v13 = vld [vmem:[#allocation4 + $0x30] sm:$0xff]  ;;  %v361_v14 = vld [vmem:[#allocation4 + $0x28] sm:$0xff]  ;;  %v360_v15 = vld [vmem:[#allocation4 + $0x20] sm:$0xff] }
  0x10   :  { %283 = vmatmul.msk.bf16.vlgmr.msra.gmra.mxu0 %vm66_vm1, %v60_v4  ;;  %158 = vmatpush.bf16.msra.mxu1 %v354_v5  ;;  %v359_v16 = vld [vmem:[#allocation4 + $0x18] sm:$0xff]  ;;  %v358_v17 = vld [vmem:[#allocation4 + $0x10] sm:$0xff]  ;;  %v368_v18 = vld [vmem:[%s497_s2] ss:$0 sm:$0xff] }
  0x11   :  { %v357_v24 = vld [vmem:[#allocation4 + $0x8] sm:$0xff]  ;;  %v356_v25 = vld [vmem:[#allocation4] sm:$0xff] }
  0x12   :  { %v369_v26 = vld [vmem:[%s499_s4] ss:$0 sm:$0xff] }
  0x13   :  { %241 = vmatpush.bf16.msra.mxu2 %v362_v13  ;;  %v370_v32 = vld [vmem:[%s501_s6] ss:$0 sm:$0xff] }
  0x14   :  { %159 = vmatpush.bf16.msra.mxu1 %v353_v6 }
  0x17   :  { %242 = vmatpush.bf16.msra.mxu2 %v361_v14 }
  0x18   :  { %160 = vmatpush.bf16.msra.mxu1 %v352_v7 }
  0x1b   :  { %243 = vmatpush.bf16.msra.mxu2 %v360_v15 }
  0x1c   :  { %161 = vmatpush.bf16.msra.mxu1 %v351_v8 }
  0x1f   :  { %244 = vmatpush.bf16.msra.mxu2 %v359_v16 }
  0x20   :  { %162 = vmatpush.bf16.msra.mxu1 %v350_v9 }
  0x23   :  { %245 = vmatpush.bf16.msra.mxu2 %v358_v17 }
  0x24   :  { %163 = vmatpush.bf16.msra.mxu1 %v349_v10 }
  0x27   :  { %246 = vmatpush.bf16.msra.mxu2 %v357_v24 }
  0x28   :  { %164 = vmatpush.bf16.msra.mxu1 %v348_v11 }
  0x2b   :  { %247 = vmatpush.bf16.msra.mxu2 %v356_v25 }
  0x8d   :  { %v83_v19 = vpop.f32.mrf.mxu0 }
  0x8e   :  { %v84_v20 = vadd.f32 %v368_v18, %v83_v19 }
  0x90   :  { %v87_v21 = vmax.f32 %v84_v20, 0.0 }
  0x92   :  { %v88_v22 = vpack.c.bf16 %v87_v21, %v87_v21 }
  0x94   :  { %165 = vmatmul.bf16.vlgmr.msra.gmra.mxu1 %v88_v22 }
  0x95   :  { %v85_v23 = vpop.f32.mrf.mxu0 }
 0x111   :  { %v166_v27 = vpop.f32.mrf.mxu1 }
 0x112   :  { %v167_v28 = vadd.f32 %v369_v26, %v166_v27 }
 0x114   :  { %v170_v29 = vmax.f32 %v167_v28, 0.0 }
 0x116   :  { %v171_v30 = vpack.c.bf16 %v170_v29, %v170_v29 }
 0x118   :  { %248 = vmatmul.bf16.vlgmr.msra.gmra.mxu2 %v171_v30 }
 0x119   :  { %v168_v31 = vpop.f32.mrf.mxu1 }
 0x19b   :  { %v249_v33 = vpop.f32.mrf.mxu2 }
 0x19c   :  { %v250_v34 = vadd.f32 %v370_v32, %v249_v33 }
 0x19e   :  { %253 = vmax.xlane.f32.xlu0 %v250_v34 }
 0x1a3   :  { %v251_v35 = vpop.f32.mrf.mxu2 }
 0x211   :  { %v254_v36 = vpop.xlane.xlu0 %253 }
 0x212   :  { %v255_v37 = vsub.f32 %v250_v34, %v254_v36 }
 0x214   :  { %v256_v38 = vmul.f32 1.442695, %v255_v37 }
 0x216   :  { %371 = vpow2.f32 %v256_v38 }
 0x21c   :  { %v372_v39 = vpop.eup %371 }
 0x21d   :  { %258 = vadd.xlane.f32.xlu0 %v372_v39 }
 0x290   :  { %v259_v40 = vpop.xlane.xlu0 %258 }
 0x291   :  { %373 = vrcp.f32 %v259_v40  ;;  %v271_v44 = vand.u32 2147483648, %v259_v40  ;;  %v269_v46 = vand.u32 2147483647, %v259_v40  ;;  %vm265_vm3 = vweird.f32 %v259_v40 }
 0x293   :  { %v272_v48 = vor.u32 1.1754944e-38, %v271_v44  ;;  %vm270_vm5 = vcmp.eq.f32.partialorder %v269_v46, 8.507059e+37 }
 0x297   :  { %v374_v41 = vpop.eup %373 }
 0x298   :  { %v261_v42 = vmul.f32 %v374_v41, %v259_v40  ;;  %vm266_vm2 = vweird.f32 %v374_v41 }
 0x299   :  { %vm267_vm4 = vmor %vm265_vm3, %vm266_vm2 }
 0x29a   :  { %v262_v43 = vsub.f32 1.0, %v261_v42 }
 0x29c   :  { %v263_v45 = vmul.f32 %v374_v41, %v262_v43 }
 0x29e   :  { %v264_v47 = vadd.f32 %v374_v41, %v263_v45 }
 0x2a0   :  { %v268_v49 = vsel %vm267_vm4, %v374_v41, %v264_v47 }
 0x2a1   :  { %v273_v50 = vsel %vm270_vm5, %v272_v48, %v268_v49 }
 0x2a2   :  { %v274_v51 = vmul.f32 %v372_v39, %v273_v50 }
 0x2a4   :  { %276 = vst.msk [vmem:[%s502_s7] sm:$0xff] %vm275_vm6, %v274_v51 }
 0x2a5   :  { %281 = vsyncpa [#allocation3], 1 }
 0x2a6   :  { %282 = vsyncpa [#allocation5], 1 }

</bundles_post_ra>
